<compile_context>
chip_gen: v6e
topology: v6e:2x2x1
jax: 0.10.0
libtpu: 0.0.40
codegen_flags: <defaults>
</compile_context>

<pallas_src>
import jax
import jax.numpy as jnp
from jax.experimental import pallas as pl
from jax.experimental.pallas import tpu as pltpu

_LANE = 128   # vreg lane width
_SUB = 8      # vreg sublane width (f32)


def _round_up(n, m):
    return ((n + m - 1) // m) * m


def _pad_axis(a, axis, target):
    pad = target - a.shape[axis]
    if pad == 0:
        return a
    widths = [(0, 0)] * a.ndim
    widths[axis] = (0, pad)
    return jnp.pad(a, widths)


def _mlp_kernel(x_ref, w1_ref, b1_ref, w2_ref, b2_ref, o_ref):
    # Leading population dim is squeezed out by the BlockSpecs -> all refs are 2D.
    # hidden = relu(x @ W1 + b1)
    h = jnp.dot(x_ref[...], w1_ref[...], preferred_element_type=jnp.float32)
    h = jnp.maximum(h + b1_ref[...], 0.0)          # b1 is (1, Hp), broadcasts over batch
    # out = hidden @ W2 + b2
    y = jnp.dot(h, w2_ref[...], preferred_element_type=jnp.float32)
    o_ref[...] = (y + b2_ref[...]).astype(o_ref.dtype)


def evolution_population_forward(x, w1, b1, w2, b2, *, batch_tile=512):
    """Evaluate a whole evolution population in one fused kernel.

    x:  (B, In)       shared input batch
    w1: (P, In, H)    per-individual layer-1 weights (stored (in, out))
    b1: (P, 1, H)
    w2: (P, H, O)
    b2: (P, 1, O)
    returns: (P, B, O)
    """
    P, In, H = w1.shape
    O = w2.shape[2]
    B = x.shape[0]

    # Lane-dense feature dims, sublane/tile-aligned batch.
    In_p = _round_up(In, _LANE)
    H_p = _round_up(H, _LANE)
    O_p = _round_up(O, _LANE)
    TB = min(batch_tile, _round_up(B, _SUB))
    B_p = _round_up(B, TB)

    x_p = _pad_axis(_pad_axis(x, 1, In_p), 0, B_p)
    w1_p = _pad_axis(_pad_axis(w1, 1, In_p), 2, H_p)
    b1_p = _pad_axis(b1, 2, H_p)
    w2_p = _pad_axis(_pad_axis(w2, 1, H_p), 2, O_p)
    b2_p = _pad_axis(b2, 2, O_p)

    grid = (P, B_p // TB)

    out = pl.pallas_call(
        _mlp_kernel,
        out_shape=jax.ShapeDtypeStruct((P, B_p, O_p), x.dtype),
        grid=grid,
        in_specs=[
            # x tile: varies with batch index, reused across population.
            pl.BlockSpec((TB, In_p), lambda p, b: (b, 0)),
            # Per-individual weights/biases: constant over the inner batch axis
            # -> stay resident in VMEM across the batch sweep.
            pl.BlockSpec((None, In_p, H_p), lambda p, b: (p, 0, 0)),
            pl.BlockSpec((None, 1, H_p), lambda p, b: (p, 0, 0)),
            pl.BlockSpec((None, H_p, O_p), lambda p, b: (p, 0, 0)),
            pl.BlockSpec((None, 1, O_p), lambda p, b: (p, 0, 0)),
        ],
        out_specs=pl.BlockSpec((None, TB, O_p), lambda p, b: (p, b, 0)),
        compiler_params=pltpu.CompilerParams(
            dimension_semantics=("parallel", "parallel"),
        ),
    )(x_p, w1_p, b1_p, w2_p, b2_p)

    return out[:, :B, :O]


def evolution_network_forward(x, w1, b1, w2, b2):
    """Single-network forward (matches EvolutionNetwork.forward semantics).

    x: (B, In); w1: (In, H); b1: (1, H); w2: (H, O); b2: (1, O) -> (B, O).
    """
    out = evolution_population_forward(
        x, w1[None], b1[None], w2[None], b2[None])
    return out[0]


def init_params(key, input_size, hidden_size, output_size):
    """Deterministic init mirroring nn.Linear's uniform(-1/sqrt(fan_in), 1/sqrt(fan_in))."""
    k1, k2, k3, k4 = jax.random.split(key, 4)
    bound1 = 1.0 / jnp.sqrt(input_size)
    bound2 = 1.0 / jnp.sqrt(hidden_size)
    # stored as (in, out) — transpose of PyTorch's (out, in)
    w1 = jax.random.uniform(k1, (input_size, hidden_size), jnp.float32, -bound1, bound1)
    b1 = jax.random.uniform(k2, (1, hidden_size), jnp.float32, -bound1, bound1)
    w2 = jax.random.uniform(k3, (hidden_size, output_size), jnp.float32, -bound2, bound2)
    b2 = jax.random.uniform(k4, (1, output_size), jnp.float32, -bound2, bound2)
    return w1, b1, w2, b2


if __name__ == "__main__":
    # Small shapes consistent with the module: batch=8, input=16, hidden=32, output=8,
    # evolution population of 4 individuals.
    batch, input_size, hidden_size, output_size = 8, 16, 32, 8
    population = 4

    key = jax.random.PRNGKey(0)
    kx, kp = jax.random.split(key)
    x = jax.random.normal(kx, (batch, input_size), jnp.float32)

    keys = jax.random.split(kp, population)
    params = [init_params(k, input_size, hidden_size, output_size) for k in keys]
    w1 = jnp.stack([p[0] for p in params])   # (P, In, H)
    b1 = jnp.stack([p[1] for p in params])   # (P, 1, H)
    w2 = jnp.stack([p[2] for p in params])   # (P, H, O)
    b2 = jnp.stack([p[3] for p in params])   # (P, 1, O)

    # Whole population in one fused pallas_call.
    out_pop = jax.block_until_ready(
        evolution_population_forward(x, w1, b1, w2, b2))

    # Pure-JAX reference.
    ref_pop = jax.vmap(
        lambda W1, B1, W2, B2: jnp.maximum(x @ W1 + B1, 0.0) @ W2 + B2
    )(w1, b1, w2, b2)
    assert out_pop.shape == (population, batch, output_size)
    assert jnp.allclose(out_pop, ref_pop, atol=1e-5, rtol=1e-5)

    # Single-network path (original module semantics).
    out_single = jax.block_until_ready(
        evolution_network_forward(x, w1[0], b1[0], w2[0], b2[0]))
    ref_single = jnp.maximum(x @ w1[0] + b1[0], 0.0) @ w2[0] + b2[0]
    assert out_single.shape == (batch, output_size)
    assert jnp.allclose(out_single, ref_single, atol=1e-5, rtol=1e-5)

    print("KERNEL_OK")
</pallas_src>

<mosaic_0001>
module attributes {stable_mosaic.version = 11 : i64} {
  func.func @_mlp_kernel(%arg0: i32, %arg1: i32, %arg2: memref<8x128xf32, #tpu.memory_space<vmem>>, %arg3: memref<1x128x128xf32, #tpu.memory_space<vmem>>, %arg4: memref<1x1x128xf32, #tpu.memory_space<vmem>>, %arg5: memref<1x128x128xf32, #tpu.memory_space<vmem>>, %arg6: memref<1x1x128xf32, #tpu.memory_space<vmem>>, %arg7: memref<1x8x128xf32, #tpu.memory_space<vmem>>) attributes {dimension_semantics = [#tpu.dimension_semantics<parallel>, #tpu.dimension_semantics<parallel>], iteration_bounds = array<i64: 4, 1>, scalar_prefetch = 0 : i64, scratch_operands = 0 : i64, tpu.core_type = #tpu.core_type<tc>, window_params = [{transform_indices = @transform_0, window_bounds = array<i64: 8, 128>}, {transform_indices = @transform_1, window_bounds = array<i64: 1, 128, 128>}, {transform_indices = @transform_2, window_bounds = array<i64: 1, 1, 128>}, {transform_indices = @transform_3, window_bounds = array<i64: 1, 128, 128>}, {transform_indices = @transform_4, window_bounds = array<i64: 1, 1, 128>}, {transform_indices = @transform_5, window_bounds = array<i64: 1, 8, 128>}]} {
    %c0 = arith.constant 0 : index
    %c0_0 = arith.constant 0 : index
    %0 = vector.load %arg2[%c0, %c0_0] : memref<8x128xf32, #tpu.memory_space<vmem>>, vector<8x128xf32>
    %c0_1 = arith.constant 0 : index
    %c0_2 = arith.constant 0 : index
    %c0_3 = arith.constant 0 : index
    %1 = vector.load %arg3[%c0_1, %c0_2, %c0_3] : memref<1x128x128xf32, #tpu.memory_space<vmem>>, vector<1x128x128xf32>
    %2 = vector.shape_cast %1 : vector<1x128x128xf32> to vector<128x128xf32>
    %cst = arith.constant dense<0.000000e+00> : vector<8x128xf32>
    %3 = tpu.matmul %0, %2, %cst {dimension_numbers = #tpu.dot_dimension_numbers<[1], [0], [0], [1], [0, 0, 1, 1], [], []>} : vector<8x128xf32>, vector<128x128xf32>, vector<8x128xf32> -> vector<8x128xf32>
    %c0_4 = arith.constant 0 : index
    %c0_5 = arith.constant 0 : index
    %c0_6 = arith.constant 0 : index
    %4 = vector.load %arg4[%c0_4, %c0_5, %c0_6] : memref<1x1x128xf32, #tpu.memory_space<vmem>>, vector<1x1x128xf32>
    %5 = vector.shape_cast %4 : vector<1x1x128xf32> to vector<1x128xf32>
    %6 = vector.broadcast %5 : vector<1x128xf32> to vector<8x128xf32>
    %7 = arith.addf %3, %6 : vector<8x128xf32>
    %cst_7 = arith.constant 0.000000e+00 : f32
    %8 = vector.broadcast %cst_7 : f32 to vector<8x128xf32>
    %9 = arith.maximumf %7, %8 : vector<8x128xf32>
    %c0_8 = arith.constant 0 : index
    %c0_9 = arith.constant 0 : index
    %c0_10 = arith.constant 0 : index
    %10 = vector.load %arg5[%c0_8, %c0_9, %c0_10] : memref<1x128x128xf32, #tpu.memory_space<vmem>>, vector<1x128x128xf32>
    %11 = vector.shape_cast %10 : vector<1x128x128xf32> to vector<128x128xf32>
    %cst_11 = arith.constant dense<0.000000e+00> : vector<8x128xf32>
    %12 = tpu.matmul %9, %11, %cst_11 {dimension_numbers = #tpu.dot_dimension_numbers<[1], [0], [0], [1], [0, 0, 1, 1], [], []>} : vector<8x128xf32>, vector<128x128xf32>, vector<8x128xf32> -> vector<8x128xf32>
    %c0_12 = arith.constant 0 : index
    %c0_13 = arith.constant 0 : index
    %c0_14 = arith.constant 0 : index
    %13 = vector.load %arg6[%c0_12, %c0_13, %c0_14] : memref<1x1x128xf32, #tpu.memory_space<vmem>>, vector<1x1x128xf32>
    %14 = vector.shape_cast %13 : vector<1x1x128xf32> to vector<1x128xf32>
    %15 = vector.broadcast %14 : vector<1x128xf32> to vector<8x128xf32>
    %16 = arith.addf %12, %15 : vector<8x128xf32>
    %c0_15 = arith.constant 0 : index
    %c0_16 = arith.constant 0 : index
    %c0_17 = arith.constant 0 : index
    %17 = vector.load %arg7[%c0_15, %c0_16, %c0_17] : memref<1x8x128xf32, #tpu.memory_space<vmem>>, vector<1x8x128xf32>
    %18 = vector.shape_cast %17 : vector<1x8x128xf32> to vector<8x128xf32>
    %19 = vector.shape_cast %16 : vector<8x128xf32> to vector<1x8x128xf32>
    tpu.vector_store %arg7[%c0_15, %c0_16, %c0_17], %19 {strides = array<i32>} : memref<1x8x128xf32, #tpu.memory_space<vmem>>, vector<1x8x128xf32>,
    return
  }
  func.func @transform_0(%arg0: i32, %arg1: i32) -> (i32, i32) {
    %c0_i32 = arith.constant 0 : i32
    %c0_i32_0 = arith.constant 0 : i32
    return %arg1, %c0_i32 : i32, i32
  }
  func.func @transform_1(%arg0: i32, %arg1: i32) -> (i32, i32, i32) {
    %c0_i32 = arith.constant 0 : i32
    %c0_i32_0 = arith.constant 0 : i32
    %c0_i32_1 = arith.constant 0 : i32
    return %arg0, %c0_i32, %c0_i32_0 : i32, i32, i32
  }
  func.func @transform_2(%arg0: i32, %arg1: i32) -> (i32, i32, i32) {
    %c0_i32 = arith.constant 0 : i32
    %c0_i32_0 = arith.constant 0 : i32
    %c0_i32_1 = arith.constant 0 : i32
    return %arg0, %c0_i32, %c0_i32_0 : i32, i32, i32
  }
  func.func @transform_3(%arg0: i32, %arg1: i32) -> (i32, i32, i32) {
    %c0_i32 = arith.constant 0 : i32
    %c0_i32_0 = arith.constant 0 : i32
    %c0_i32_1 = arith.constant 0 : i32
    return %arg0, %c0_i32, %c0_i32_0 : i32, i32, i32
  }
  func.func @transform_4(%arg0: i32, %arg1: i32) -> (i32, i32, i32) {
    %c0_i32 = arith.constant 0 : i32
    %c0_i32_0 = arith.constant 0 : i32
    %c0_i32_1 = arith.constant 0 : i32
    return %arg0, %c0_i32, %c0_i32_0 : i32, i32, i32
  }
  func.func @transform_5(%arg0: i32, %arg1: i32) -> (i32, i32, i32) {
    %c0_i32 = arith.constant 0 : i32
    %c0_i32_0 = arith.constant 0 : i32
    return %arg0, %arg1, %c0_i32 : i32, i32, i32
  }
}

</mosaic_0001>

<bundles_post_ra>
// kernel: tpu_custom_call.1
= control target key start
LH: loop header
LB: loop body
LE: loop exit
PB: predicated region body
PF: predicated region fallthrough
CT: control target
= control target key end

     0   :  { %s1463_s0 = inlined_call_operand.hbm [shape: f32[8,128], index: 0, kind: input, shape index: {}]   ;;  %s1464_s1 = inlined_call_operand.hbm [shape: f32[4,128,128], index: 1, kind: input, shape index: {}]   ;;  %s1465_s2 = inlined_call_operand.hbm [shape: f32[4,1,128], index: 2, kind: input, shape index: {}]   ;;  %s1466_s3 = inlined_call_operand.hbm [shape: f32[4,128,128], index: 3, kind: input, shape index: {}]   ;;  %s1467_s4 = inlined_call_operand.vmem [shape: f32[4,1,128], index: 4, kind: input, shape index: {}]   ;;  %s1468_s5 = inlined_call_operand.hbm [shape: f32[4,8,128], index: 5, kind: output, shape index: {}]  }
   0x1   :  { %1478 = sst [smem:[#allocation17_spill]] %s1464_s1 }
   0x2   :  { %10 = vsyncpa [#allocation3], 0 }
   0x3   :  { %11 = vsyncpa [#allocation6], 0 }
   0x4   :  { %13 = vsyncpa [#allocation6 + $0x1], 0 }
   0x5   :  { %14 = vsyncpa [#allocation9], 0 }
   0x6   :  { %16 = vsyncpa [#allocation9 + $0x1], 0 }
   0x7   :  { %17 = vsyncpa [#allocation4], 0 }
   0x8   :  { %19 = vsyncpa [#allocation4 + $0x1], 0  ;;  %s1163_s18 = smov 0   ;;  %s1165_s19 = smov 0  }
   0x9   :  { %s1167_s20 = smov 0   ;;  %s1169_s21 = smov 0  }
   0xa   :  { %s1171_s22 = smov 0   ;;  %s1173_s23 = smov 0  }
   0xb LB: > { %s37_s24 = sadd.s32 1, %s1118_s22  ;;  %s70_s25 = sadd.s32 1, %s1110_s20  ;;  %s1122_s23 = sphi %s1173_s23, %s25_s23   ;;  %s1118_s22 = sphi %s1171_s22, %s1504_s22   ;;  %s1114_s21 = sphi %s1169_s21, %s1503_s21   ;;  %s1110_s20 = sphi %s1167_s20, %s1502_s20   ;;  %s1106_s19 = sphi %s1165_s19, %s1501_s19   ;;  %s1102_s18 = sphi %s1163_s18, %s1500_s18  }
   0xc   : > { %p39_p0 = scmp.ge.s32.totalorder %s37_s24, 4  ;;  %p77_p1 = scmp.ne.s32.totalorder %s1110_s20, %s1106_s19 }
   0xd   : > { %p78_p2 = scmp.eq.s32.totalorder %s1122_s23, 0  ;;  %p868_p4 = scmp.lt.s32.totalorder %s1122_s23, 4 }
   0xe   : > { %s1506_s24 = smov (%p39_p0, %s37_s24), 0  ;;  %s226_s27 = sand.u32 1, %s1122_s23  }
   0xf   : > { %1479 = sst [smem:[#allocation15_spill]] %s1506_s24  ;;  %p79_p3 = por %p78_p2, %p77_p1 }
  0x10   : > { %s67_s26 = ssub.s32 %s1118_s22, %s1506_s24  ;;  %s1208_s28 = sand.u32 1, %s1110_s20  }
  0x11   : > { %p68_p5 = scmp.eq.s32.totalorder %s67_s26, 0  ;;  %s1472_s29 = sshll.u32 %s1118_s22, 11 }
  0x12   : > { %s1471_s6 = sshll.u32 %s1208_s28, 7  ;;  %s1481_s1 = sld [smem:[#allocation17_spill]] }
  0x13   : > { %s1212_s30 = scalar_select %p68_p5, %s1110_s20, %s70_s25  }
  0x14   : > { %p1220_p6 = pnand %p868_p4, %p79_p3  ;;  %s230_s11 = scalar_lea.vmem [#allocation5], %s1471_s6 }
  0x15   : > { %1480 = sst [smem:[#allocation16_spill]] %s1212_s30  ;;  %s237_s12 = sshll.u32 %s230_s11, 4  ;;  %s238_s12 = int_to_ptr.vmem [resolvable:$true] %s237_s12 }
  0x16   : > { %s1226_s13 = scalar_lea.sflag [#allocation6], %s226_s27  ;;  %p1476_p7 = pneg %p1220_p6 }
  0x17   : > { %s937_s14 = scalar_lea.vmem %s238_s12, 2048  ;;  %s1124_s15 = smov [#allocation5]  }
  0x18   : > { %s236_s9 = scalar_lea.hbm %s1481_s1, %s1472_s29  ;;  %p938_p8 = scmp.ne.s32.totalorder %s238_s12, %s937_s14 }
  0x19   : > { %s942_s16 = sshll.u32 %s1124_s15, 4  ;;  %s943_s16 = int_to_ptr.vmem [resolvable:$false] %s942_s16 }
  0x1a   : > { %p940_p9 = pnand %p938_p8, %p1476_p7  ;;  %s944_s17 = scalar_lea.vmem %s943_s16, 4096 }
  0x1b   : > { %p945_p11 = scmp.lt.s32.totalorder %s238_s12, %s943_s16  ;;  %p946_p12 = scmp.lt.s32.totalorder %s944_s17, %s937_s14 }
  0x1c   : > { %p941_p10 = pneg %p940_p9 }
  0x1d   : > { %p947_p13 = por %p946_p12, %p945_p11 }
  0x1f   : > { %p948_p0 = pnand %p947_p13, %p941_p10 }
  0x21   : > { %951 = shalt.err (!%p948_p0)
}
  0x22   : > { %s1469_s25 = smov 128   ;;  %s1470_s26 = smov 8  }
  0x23   : > { %856 = dma.hbm_to_vmem [thread:$0]  (!%p1220_p6), %s236_s9, 2048, %s238_s12, %s1226_s13, %s1469_s25, %s1469_s25, %s1470_s26  }
  0x24   : > { %s1240_s27 = sadd.s32 4294967295, %s1122_s23   ;;  %s709_s7 = sadd.s32 4294967294, %s1122_s23  }
  0x25   : > { %p83_p2 = scmp.ne.s32.totalorder %s1106_s19, %s1102_s18  ;;  %p1475_p3 = scmp.eq.s32.totalorder %s1240_s27, 0 }
  0x26   : > { %p187_p4 = scmp.eq.s32.totalorder %s1240_s27, 3  ;;  %p193_p5 = scmp.eq.s32.totalorder %s709_s7, 3 }
  0x27   : > { %p710_p8 = scmp.ge.s32.totalorder %s1122_s23, 1  ;;  %p1250_p9 = por %p1475_p3, %p83_p2 }
  0x28   : > { %p1257_p10 = por %p187_p4, %p77_p1  ;;  %p1261_p11 = por %p193_p5, %p83_p2 }
  0x29   : > { %s1483_s8 = scalar_select %p1250_p9, 1, 0 }
  0x2a   : > { %s1484_s9 = scalar_select %p1257_p10, 1, 0 }
  0x2b   : > { %s1485_s11 = scalar_select %p1261_p11, 1, 0 }
  0x2c   : > { %p200_p12 = scmp.lt.s32.totalorder %s1122_s23, 5  ;;  %s1127_s14 = smov [#allocation2]  }
  0x2d   : > { %s215_s15 = sshll.u32 %s1127_s14, 4  ;;  %s716_s16 = sshll.u32 %s1118_s22, 4  ;;  %s1270_s15 = int_to_ptr.vmem [resolvable:$true] %s215_s15 }
  0x2e   : > { %p1266_p13 = pnand %p710_p8, %p200_p12  ;;  %s255_s25 = scalar_lea.hbm %s1465_s2, %s716_s16 }
  0x2f   : > { %s250_s26 = scalar_lea.vmem [#allocation7], %s1208_s28  ;;  %s1128_s14 = smov [#allocation7]  }
  0x30   : > { %p849_p1 = pneg %p1266_p13  ;;  %s257_s6 = sshll.u32 %s250_s26, 4  ;;  %s258_s6 = int_to_ptr.vmem [resolvable:$true] %s257_s6 }
  0x31   : > { %s965_s1 = scalar_lea.vmem %s258_s6, 16  ;;  %s970_s24 = sshll.u32 %s1128_s14, 4  ;;  %s971_s24 = int_to_ptr.vmem [resolvable:$false] %s970_s24 }
  0x32   : > { %p1281_p0 = pnand %p849_p1, %p1475_p3  ;;  %p966_p2 = scmp.ne.s32.totalorder %s258_s6, %s965_s1 }
  0x33   : > { %s972_s30 = scalar_lea.vmem %s971_s24, 32  ;;  %p973_p8 = scmp.lt.s32.totalorder %s258_s6, %s971_s24 }
  0x34   : > { %p968_p4 = pnand %p966_p2, %p1476_p7  ;;  %p974_p12 = scmp.lt.s32.totalorder %s972_s30, %s965_s1 }
  0x36   : > { %p969_p5 = pneg %p968_p4  ;;  %p975_p11 = por %p974_p12, %p973_p8 }
  0x38   : > { %p976_p10 = pnand %p975_p11, %p969_p5 }
  0x3a   : > { %979 = shalt.err (!%p976_p10)
}
  0x3b   : > { %859 = dma.hbm_to_vmem [thread:$0]  (!%p1220_p6), %s255_s25, 16, %s258_s6, %s1226_s13  }
  0x3c   : > { %p982_p1 = pneg %p1281_p0  ;;  %s991_s26 = scalar_lea.vmem %s1270_s15, 128 }
  0x3d   : > { %p992_p2 = scmp.ne.s32.totalorder %s1270_s15, %s991_s26  ;;  %p999_p7 = scmp.lt.s32.totalorder %s1270_s15, %s1270_s15 }
  0x3e   : > { %p1000_p9 = scmp.lt.s32.totalorder %s991_s26, %s991_s26 }
  0x3f   : > { %p994_p4 = pnand %p992_p2, %p982_p1 }
  0x40   : > { %p1001_p8 = por %p1000_p9, %p999_p7 }
  0x41   : > { %p995_p3 = pneg %p994_p4 }
  0x43   : > { %p1002_p11 = pnand %p1001_p8, %p995_p3 }
  0x45   : > { %1005 = shalt.err (!%p1002_p11)
}
  0x46   : > { %852 = dma.hbm_to_vmem [thread:$0]  (!%p1281_p0), %s1463_s0, 128, %s1270_s15, [#allocation3]  }
  0x47   : > { %s1488_s30 = sshll.u32 %s1118_s22, 11  ;;  %s1489_s16 = sshll.u32 %s1208_s28, 7 }
  0x48   : > { %s274_s25 = scalar_lea.hbm %s1466_s3, %s1488_s30  ;;  %s268_s17 = scalar_lea.vmem [#allocation8], %s1489_s16 }
  0x49   : > { %s275_s7 = sshll.u32 %s268_s17, 4  ;;  %s265_s14 = scalar_lea.sflag [#allocation9], %s1208_s28  ;;  %s276_s7 = int_to_ptr.vmem [resolvable:$true] %s275_s7 }
  0x4a   : > { %s1019_s29 = scalar_lea.vmem %s276_s7, 2048  ;;  %p1490_p3 = pneg %p1220_p6 }
  0x4b   : > { %p1020_p7 = scmp.ne.s32.totalorder %s276_s7, %s1019_s29  ;;  %s1129_s26 = smov [#allocation8]  }
  0x4c   : > { %s1024_s1 = sshll.u32 %s1129_s26, 4  ;;  %s1025_s1 = int_to_ptr.vmem [resolvable:$false] %s1024_s1 }
  0x4d   : > { %p1022_p9 = pnand %p1020_p7, %p1490_p3  ;;  %s1026_s15 = scalar_lea.vmem %s1025_s1, 4096 }
  0x4e   : > { %p1027_p0 = scmp.lt.s32.totalorder %s276_s7, %s1025_s1  ;;  %p1028_p5 = scmp.lt.s32.totalorder %s1026_s15, %s1019_s29 }
  0x4f   : > { %p1023_p10 = pneg %p1022_p9 }
  0x50   : > { %p1029_p12 = por %p1028_p5, %p1027_p0 }
  0x52   : > { %p1030_p1 = pnand %p1029_p12, %p1023_p10 }
  0x54   : > { %1033 = shalt.err (!%p1030_p1)
}
  0x55   : > { %s1491_s24 = smov 8   ;;  %s1492_s30 = smov 128  }
  0x56   : > { %862 = dma.hbm_to_vmem [thread:$0]  (!%p1220_p6), %s274_s25, 2048, %s276_s7, %s265_s14, %s1492_s30, %s1492_s30, %s1491_s24  }
  0x57   : > { %293 = sbr.rel (%p1266_p13) target bundleno = 540 (0x21c), region = 40  ;;  %p1493_p2 = scmp.eq.s32.totalorder (!%p1266_p13), %s1240_s27, 0 }
  0x5c   : > { %1085 = dma.done.wait (%p1493_p2), [#allocation3], 128   ;;  %p1494_p4 = pmov %p1493_p2 }
  0x5d   : > { %s299_s28 = sand.u32 1, %s1240_s27   ;;  %s1327_s6 = sand.u32 1, %s1106_s19  }
  0x5e   : > { %1087 = vsyncadd (%p1494_p4), [#allocation3], 4294967168  ;;  %s722_s10 = sshll.u32 %s1327_s6, 7  ;;  %s300_s13 = scalar_lea.sflag [#allocation6], %s299_s28 }
  0x5f   : > { %s1330_s16 = scalar_lea.vmem [#allocation5], %s722_s10  ;;  %p1495_p6 = scmp.ne.s32.totalorder %s1483_s8, 0 }
  0x61   : > { %1089 = dma.done.wait (%p1495_p6), %s300_s13, 2064  }
  0x62   : > { %1091 = vsyncadd (%p1495_p6), %s300_s13, 4294965232  ;;  %s311_s12 = scalar_lea.vmem [#allocation7], %s1327_s6  ;;  %s317_s25 = scalar_lea.sflag [#allocation9], %s1327_s6 }
  0x63   : > { %s1338_s17 = scalar_lea.vmem [#allocation8], %s722_s10 }
  0x64   : > { %1093 = dma.done.wait (%p1495_p6), %s317_s25, 2048  }
  0x65   : > { %1095 = vsyncadd (%p1495_p6), %s317_s25, 4294965248  ;;  %v1130_v0 = vmov 0.0   ;;  %vm1131_vm0 = vmmov 0   ;;  %v378_v1 = vld [vmem:[%s1330_s16 + $0x78] sm:$0xff]  ;;  %v377_v2 = vld [vmem:[%s1330_s16 + $0x70] sm:$0xff]  ;;  %p359_p13 = scmp.lt.s32.totalorder %s1114_s21, 3 }
  0x66   : > { %767 = vmatprep.subr.mxu0 %v1130_v0  ;;  %799 = vmatprep.mubr.msk.f32.mxu0 %vm1131_vm0, %v1130_v0  ;;  %v376_v3 = vld [vmem:[%s1330_s16 + $0x68] sm:$0xff]  ;;  %v375_v4 = vld [vmem:[%s1330_s16 + $0x60] sm:$0xff]  ;;  %v374_v6 = vld [vmem:[%s1330_s16 + $0x58] sm:$0xff]  ;;  %s724_s8 = sshll.u32 %s1327_s6, 3  ;;  %s728_s26 = sshll.u32 %s1114_s21, 7 }
  0x67   : > { %802 = vmatprep.subr.mxu1 %v1130_v0  ;;  %834 = vmatprep.mubr.msk.f32.mxu1 %vm1131_vm0, %v1130_v0  ;;  %v472_v5 = vld [vmem:[%s1338_s17 + $0x78] sm:$0xff]  ;;  %v471_v7 = vld [vmem:[%s1338_s17 + $0x70] sm:$0xff]  ;;  %v470_v8 = vld [vmem:[%s1338_s17 + $0x68] sm:$0xff]  ;;  %s360_s27 = scalar_select %p359_p13, %s1114_s21, 3 }
  0x68   : > { %768 = vmatpush3.msra.mxu0 %v378_v1  ;;  %803 = vmatpush3.msra.mxu1 %v472_v5  ;;  %v373_v9 = vld [vmem:[%s1330_s16 + $0x50] sm:$0xff]  ;;  %v469_v10 = vld [vmem:[%s1338_s17 + $0x60] sm:$0xff]  ;;  %v468_v12 = vld [vmem:[%s1338_s17 + $0x58] sm:$0xff]  ;;  %s358_s1 = scalar_lea.vmem [#allocation10], %s724_s8  ;;  %s1422_s28 = scalar_lea.hbm %s1468_s5, %s728_s26 }
  0x69   : > { %769 = vmatprep.subr.mxu0 %v1130_v0  ;;  %804 = vmatprep.subr.mxu1 %v1130_v0  ;;  %v372_v11 = vld [vmem:[%s1330_s16 + $0x48] sm:$0xff]  ;;  %v371_v13 = vld [vmem:[%s1330_s16 + $0x40] sm:$0xff]  ;;  %v467_v14 = vld [vmem:[%s1338_s17 + $0x50] sm:$0xff]  ;;  %s361_s29 = scalar_lea.vmem %s1467_s4, %s360_s27  ;;  %s566_s15 = sshll.u32 %s358_s1, 4  ;;  %s567_s15 = int_to_ptr.vmem [resolvable:$true] %s566_s15 }
  0x6a   : > { %770 = vmatpush3.msra.mxu0 %v377_v2  ;;  %805 = vmatpush3.msra.mxu1 %v471_v7  ;;  %v370_v15 = vld [vmem:[%s1330_s16 + $0x38] sm:$0xff]  ;;  %v466_v16 = vld [vmem:[%s1338_s17 + $0x48] sm:$0xff]  ;;  %v465_v18 = vld [vmem:[%s1338_s17 + $0x40] sm:$0xff]  ;;  %s552_s10 = scalar_lea.sflag [#allocation4], %s1327_s6  ;;  %s1034_s13 = scalar_lea.vmem %s567_s15, 128 }
  0x6b   : > { %771 = vmatprep.subr.mxu0 %v1130_v0  ;;  %806 = vmatprep.subr.mxu1 %v1130_v0  ;;  %v369_v17 = vld [vmem:[%s1330_s16 + $0x30] sm:$0xff]  ;;  %v368_v19 = vld [vmem:[%s1330_s16 + $0x28] sm:$0xff]  ;;  %v464_v20 = vld [vmem:[%s1338_s17 + $0x38] sm:$0xff]  ;;  %p1035_p8 = scmp.ne.s32.totalorder %s567_s15, %s1034_s13  ;;  %p1496_p11 = scmp.ne.s32.totalorder %s1484_s9, 0 }
  0x6c   : > { %772 = vmatpush3.msra.mxu0 %v376_v3  ;;  %807 = vmatpush3.msra.mxu1 %v470_v8  ;;  %v367_v21 = vld [vmem:[%s1330_s16 + $0x20] sm:$0xff]  ;;  %v463_v22 = vld [vmem:[%s1338_s17 + $0x30] sm:$0xff]  ;;  %v462_v24 = vld [vmem:[%s1338_s17 + $0x28] sm:$0xff] }
  0x6d   : > { %773 = vmatprep.subr.mxu0 %v1130_v0  ;;  %808 = vmatprep.subr.mxu1 %v1130_v0  ;;  %v366_v23 = vld [vmem:[%s1330_s16 + $0x18] sm:$0xff]  ;;  %v365_v25 = vld [vmem:[%s1330_s16 + $0x10] sm:$0xff]  ;;  %v461_v26 = vld [vmem:[%s1338_s17 + $0x20] sm:$0xff]  ;;  %p1036_p7 = pnand %p1035_p8, %p1496_p11 }
  0x6e   : > { %774 = vmatpush3.msra.mxu0 %v375_v4  ;;  %809 = vmatpush3.msra.mxu1 %v469_v10  ;;  %v364_v27 = vld [vmem:[%s1330_s16 + $0x8] sm:$0xff]  ;;  %v460_v28 = vld [vmem:[%s1338_s17 + $0x18] sm:$0xff]  ;;  %v459_v31 = vld [vmem:[%s1338_s17 + $0x10] sm:$0xff] }
  0x6f   : > { %775 = vmatprep.subr.mxu0 %v1130_v0  ;;  %810 = vmatprep.subr.mxu1 %v1130_v0  ;;  %v363_v29 = vld [vmem:[%s1330_s16] sm:$0xff]  ;;  %v362_v30 = vld [vmem:[#allocation2] sm:$0xff]  ;;  %v458_v32 = vld [vmem:[%s1338_s17 + $0x8] sm:$0xff]  ;;  %p1037_p3 = pneg %p1036_p7  ;;  %s1132_s16 = smov [#allocation10]  }
  0x70   : > { %776 = vmatpush3.msra.mxu0 %v374_v6  ;;  %811 = vmatpush3.msra.mxu1 %v468_v12  ;;  %v457_v33 = vld [vmem:[%s1338_s17] sm:$0xff]  ;;  %v725_v34 = vld [vmem:[%s311_s12] ss:$0 sm:$0xff]  ;;  %s1038_s21 = sshll.u32 %s1132_s16, 4  ;;  %s1039_s21 = int_to_ptr.vmem [resolvable:$false] %s1038_s21 }
  0x71   : > { %777 = vmatprep.subr.mxu0 %v1130_v0  ;;  %812 = vmatprep.subr.mxu1 %v1130_v0  ;;  %v726_v39 = vld [vmem:[%s361_s29] ss:$0 sm:$0xff]  ;;  %s1040_s12 = scalar_lea.vmem %s1039_s21, 256  ;;  %p1041_p9 = scmp.lt.s32.totalorder %s567_s15, %s1039_s21 }
  0x72   : > { %778 = vmatpush3.msra.mxu0 %v373_v9  ;;  %813 = vmatpush3.msra.mxu1 %v467_v14  ;;  %p1042_p10 = scmp.lt.s32.totalorder %s1040_s12, %s1034_s13 }
  0x73   : > { %779 = vmatprep.subr.mxu0 %v1130_v0  ;;  %814 = vmatprep.subr.mxu1 %v1130_v0 }
  0x74   : > { %780 = vmatpush3.msra.mxu0 %v372_v11  ;;  %815 = vmatpush3.msra.mxu1 %v466_v16  ;;  %p1043_p0 = por %p1042_p10, %p1041_p9 }
  0x75   : > { %781 = vmatprep.subr.mxu0 %v1130_v0  ;;  %816 = vmatprep.subr.mxu1 %v1130_v0 }
  0x76   : > { %782 = vmatpush3.msra.mxu0 %v371_v13  ;;  %817 = vmatpush3.msra.mxu1 %v465_v18  ;;  %p1044_p5 = pnand %p1043_p0, %p1037_p3 }
  0x77   : > { %783 = vmatprep.subr.mxu0 %v1130_v0  ;;  %818 = vmatprep.subr.mxu1 %v1130_v0 }
  0x78   : > { %784 = vmatpush3.msra.mxu0 %v370_v15  ;;  %819 = vmatpush3.msra.mxu1 %v464_v20 }
  0x79   : > { %785 = vmatprep.subr.mxu0 %v1130_v0  ;;  %820 = vmatprep.subr.mxu1 %v1130_v0 }
  0x7a   : > { %786 = vmatpush3.msra.mxu0 %v369_v17  ;;  %821 = vmatpush3.msra.mxu1 %v463_v22 }
  0x7b   : > { %787 = vmatprep.subr.mxu0 %v1130_v0  ;;  %822 = vmatprep.subr.mxu1 %v1130_v0 }
  0x7c   : > { %788 = vmatpush3.msra.mxu0 %v368_v19  ;;  %823 = vmatpush3.msra.mxu1 %v462_v24 }
  0x7d   : > { %789 = vmatprep.subr.mxu0 %v1130_v0  ;;  %824 = vmatprep.subr.mxu1 %v1130_v0 }
  0x7e   : > { %790 = vmatpush3.msra.mxu0 %v367_v21  ;;  %825 = vmatpush3.msra.mxu1 %v461_v26 }
  0x7f   : > { %791 = vmatprep.subr.mxu0 %v1130_v0  ;;  %826 = vmatprep.subr.mxu1 %v1130_v0 }
  0x80   : > { %792 = vmatpush3.msra.mxu0 %v366_v23  ;;  %827 = vmatpush3.msra.mxu1 %v460_v28 }
  0x81   : > { %793 = vmatprep.subr.mxu0 %v1130_v0  ;;  %828 = vmatprep.subr.mxu1 %v1130_v0 }
  0x82   : > { %794 = vmatpush3.msra.mxu0 %v365_v25  ;;  %829 = vmatpush3.msra.mxu1 %v459_v31 }
  0x83   : > { %795 = vmatprep.subr.mxu0 %v1130_v0  ;;  %830 = vmatprep.subr.mxu1 %v1130_v0 }
  0x84   : > { %796 = vmatpush3.msra.mxu0 %v364_v27  ;;  %831 = vmatpush3.msra.mxu1 %v458_v32 }
  0x85   : > { %797 = vmatprep.subr.mxu0 %v1130_v0  ;;  %832 = vmatprep.subr.mxu1 %v1130_v0 }
  0x86   : > { %798 = vmatpush3.msra.mxu0 %v363_v29  ;;  %833 = vmatpush3.msra.mxu1 %v457_v33 }
  0x87   : > { %800 = vmatmul.mubr.f32.vlgmr.msra.gmra.mxu0 %v362_v30 }
 0x147   : > { %v452_v35 = vpop.f32.mrf.mxu0 }
 0x148   : > { %v453_v36 = vadd.f32 %v725_v34, %v452_v35 }
 0x149   : > { %v801_v37 = vpop.f32.mrf.mxu0 }
 0x14a   : > { %v456_v38 = vmax.f32 %v453_v36, 0.0 }
 0x14c   : > { %835 = vmatmul.mubr.f32.vlgmr.msra.gmra.mxu1 %v456_v38 }
 0x20c   : > { %v546_v40 = vpop.f32.mrf.mxu1 }
 0x20d   : > { %v547_v41 = vadd.f32 %v726_v39, %v546_v40 }
 0x20e   : > { %v836_v42 = vpop.f32.mrf.mxu1 }
 0x20f   : > { %550 = vst [vmem:[%s358_s1] sm:$0xff] %v547_v41 }
 0x210   : > { %1047 = shalt.err (!%p1044_p5)
}
 0x211   : > { %s1048_s25 = scalar_lea.hbm %s1422_s28, 128  ;;  %s1052_s27 = scalar_lea.hbm %s1468_s5, 512 }
 0x212   : > { %p1049_p12 = scmp.ne.s32.totalorder %s1422_s28, %s1048_s25  ;;  %p1053_p4 = scmp.lt.s32.totalorder %s1422_s28, %s1468_s5 }
 0x213   : > { %p1054_p6 = scmp.lt.s32.totalorder %s1052_s27, %s1048_s25 }
 0x214   : > { %p1050_p1 = pnand %p1049_p12, %p1496_p11 }
 0x215   : > { %p1055_p13 = por %p1054_p6, %p1053_p4 }
 0x216   : > { %p1051_p2 = pneg %p1050_p1 }
 0x218   : > { %p1056_p8 = pnand %p1055_p13, %p1051_p2 }
 0x21a   : > { %1059 = shalt.err (!%p1056_p8)
}
 0x21b   : > { %847 = dma.vmem_to_hbm [thread:$0]  (%p1496_p11), %s567_s15, 128, %s1422_s28, %s552_s10  }
 0x21c PF: > { %p870_p7 = scmp.ge.s32.totalorder %s1122_s23, 2  ;;  %s578_s14 = sand.u32 1, %s1102_s18  }
 0x21d   : > { %p1497_p3 = scmp.ne.s32.totalorder %s1485_s11, 0  ;;  %s579_s29 = scalar_lea.sflag [#allocation4], %s578_s14 }
 0x21f   : > { %p864_p9 = pnand %p870_p7, %p1497_p3 }
 0x221   : > { %p865_p10 = pneg %p864_p9 }
 0x223   : > { %1097 = dma.done.wait (%p865_p10), %s579_s29, 128  }
 0x224   : > { %1099 = vsyncadd (%p865_p10), %s579_s29, 4294967168  ;;  %s25_s23 = sadd.s32 1, %s1122_s23   ;;  %s1498_s9 = sld [smem:[#allocation16_spill]] }
 0x225   : > { %p22_p0 = scmp.ge.s32.totalorder %s25_s23, 6   ;;  %s1499_s26 = sld [smem:[#allocation15_spill]] }
 0x226   : > { %s1500_s18 = smov %s1106_s19  ;;  %s1501_s19 = smov %s1110_s20 }
 0x227   : > { %s1503_s21 = smov %s1118_s22  ;;  %24 = sbr.rel (!%p22_p0) target bundleno = 11 (0xb), region = 118 }
 0x22a   : > { %s1502_s20 = smov %s1498_s9 }
 0x22b   : > { %s1504_s22 = smov %s1499_s26 }
 0x22c   :  { %584 = vsyncpa [#allocation3], 1 }
 0x22d   :  { %586 = vsyncpa [#allocation3 + $0x1], 1 }
 0x22e   :  { %587 = vsyncpa [#allocation6], 1 }
 0x22f   :  { %589 = vsyncpa [#allocation6 + $0x1], 1 }
 0x230   :  { %590 = vsyncpa [#allocation9], 1 }
 0x231   :  { %592 = vsyncpa [#allocation9 + $0x1], 1 }
 0x232   :  { %593 = vsyncpa [#allocation4], 1 }
 0x233   :  { %595 = vsyncpa [#allocation4 + $0x1], 1 }

</bundles_post_ra>
